<compile_context>
chip_gen: v6e
topology: v6e:2x2x1
jax: 0.10.0
libtpu: 0.0.40
codegen_flags: <defaults>
</compile_context>

<pallas_src>
import jax
import jax.numpy as jnp
from jax.experimental import pallas as pl
from jax.experimental.pallas import tpu as pltpu

LANE = 128
SUBLANE = 8
IN_FEATURES = 2
HIDDEN = 128
NUM_CLASSES = 2
MAX_BLOCK_B = 512


def _round_up(n, m):
    return ((n + m - 1) // m) * m


def _mlp_kernel(x_ref, w1_ref, b1_ref, w2_ref, b2_ref, w3_ref, b3_ref,
                logits_ref, feat_ref):
    # Layer 1: x @ W1 + b1, ReLU  (MXU matmul, f32 accumulation)
    h = jnp.dot(x_ref[...], w1_ref[...], preferred_element_type=jnp.float32)
    h = jnp.maximum(h + b1_ref[...], 0.0)
    # Layer 2: h @ W2 + b2, ReLU -> feature
    f = jnp.dot(h, w2_ref[...], preferred_element_type=jnp.float32)
    f = jnp.maximum(f + b2_ref[...], 0.0)
    feat_ref[...] = f.astype(feat_ref.dtype)          # lane-dense (block_b, 128) store
    # Layer 3: f @ W3 + b3 -> logits (W3/b3 padded to 128 lanes; sliced in wrapper)
    z = jnp.dot(f, w3_ref[...], preferred_element_type=jnp.float32)
    logits_ref[...] = (z + b3_ref[...]).astype(logits_ref.dtype)


@jax.jit
def logistic_regression_forward(x, params):
    """x: (B, IN_FEATURES) f32. params: padded, pre-transposed weights (pad_params)."""
    w1, b1 = params["w1"], params["b1"]
    w2, b2 = params["w2"], params["b2"]
    w3, b3 = params["w3"], params["b3"]

    B, in_dim = x.shape
    in_pad, hid = w1.shape
    out_pad = w3.shape[1]

    # Pad batch to a sublane multiple; single grid step for small problems.
    b_pad = _round_up(B, SUBLANE)
    block_b = b_pad if b_pad <= MAX_BLOCK_B else MAX_BLOCK_B
    b_pad = _round_up(b_pad, block_b)

    xp = jnp.zeros((b_pad, in_pad), x.dtype).at[:B, :in_dim].set(x)

    grid = (b_pad // block_b,)
    flops = 2 * b_pad * (in_pad * hid + hid * hid + hid * out_pad)
    bytes_accessed = 4 * (xp.size + w1.size + b1.size + w2.size + b2.size
                          + w3.size + b3.size + b_pad * out_pad + b_pad * hid)

    logits_full, feat_full = pl.pallas_call(
        _mlp_kernel,
        out_shape=(jax.ShapeDtypeStruct((b_pad, out_pad), x.dtype),
                   jax.ShapeDtypeStruct((b_pad, hid), x.dtype)),
        grid_spec=pltpu.PrefetchScalarGridSpec(
            num_scalar_prefetch=0,
            grid=grid,
            in_specs=[
                pl.BlockSpec((block_b, in_pad), lambda i: (i, 0)),   # x tile over batch
                pl.BlockSpec((in_pad, hid), lambda i: (0, 0)),       # W1 (constant block)
                pl.BlockSpec((1, hid), lambda i: (0, 0)),            # b1
                pl.BlockSpec((hid, hid), lambda i: (0, 0)),          # W2
                pl.BlockSpec((1, hid), lambda i: (0, 0)),            # b2
                pl.BlockSpec((hid, out_pad), lambda i: (0, 0)),      # W3 (128-lane padded)
                pl.BlockSpec((1, out_pad), lambda i: (0, 0)),        # b3
            ],
            out_specs=[
                pl.BlockSpec((block_b, out_pad), lambda i: (i, 0)),  # logits (lane-dense)
                pl.BlockSpec((block_b, hid), lambda i: (i, 0)),      # feat   (lane-dense)
            ],
        ),
        compiler_params=pltpu.CompilerParams(
            dimension_semantics=("parallel",),
        ),
        cost_estimate=pl.CostEstimate(
            flops=flops, transcendentals=0, bytes_accessed=bytes_accessed),
    )(xp, w1, b1, w2, b2, w3, b3)

    return {"logits": logits_full[:B, :NUM_CLASSES], "feat": feat_full[:B, :]}


def init_params(key, dtype=jnp.float32):
    """nn.Linear default init U(-1/sqrt(fan_in), 1/sqrt(fan_in)); stored pre-transposed (in, out)."""
    ks = jax.random.split(key, 6)
    bound1 = 1.0 / (IN_FEATURES ** 0.5)
    bound2 = 1.0 / (HIDDEN ** 0.5)
    return {
        "w1": jax.random.uniform(ks[0], (IN_FEATURES, HIDDEN), dtype, -bound1, bound1),
        "b1": jax.random.uniform(ks[1], (1, HIDDEN), dtype, -bound1, bound1),
        "w2": jax.random.uniform(ks[2], (HIDDEN, HIDDEN), dtype, -bound2, bound2),
        "b2": jax.random.uniform(ks[3], (1, HIDDEN), dtype, -bound2, bound2),
        "w3": jax.random.uniform(ks[4], (HIDDEN, NUM_CLASSES), dtype, -bound2, bound2),
        "b3": jax.random.uniform(ks[5], (1, NUM_CLASSES), dtype, -bound2, bound2),
    }


def pad_params(params):
    """One-time zero-padding of feature dims to lane width (128) for the kernel."""
    in_pad = _round_up(IN_FEATURES, LANE)
    out_pad = _round_up(NUM_CLASSES, LANE)
    p = dict(params)
    p["w1"] = (jnp.zeros((in_pad, HIDDEN), params["w1"].dtype)
               .at[:IN_FEATURES, :].set(params["w1"]))
    p["w3"] = (jnp.zeros((HIDDEN, out_pad), params["w3"].dtype)
               .at[:, :NUM_CLASSES].set(params["w3"]))
    p["b3"] = (jnp.zeros((1, out_pad), params["b3"].dtype)
               .at[:, :NUM_CLASSES].set(params["b3"]))
    return p


def reference_forward(x, params):
    h = jnp.maximum(x @ params["w1"] + params["b1"], 0.0)
    feat = jnp.maximum(h @ params["w2"] + params["b2"], 0.0)
    logits = feat @ params["w3"] + params["b3"]
    return {"logits": logits, "feat": feat}


if __name__ == "__main__":
    key = jax.random.PRNGKey(0)
    kx, kp = jax.random.split(key)

    B = 16
    x = jax.random.normal(kx, (B, IN_FEATURES), dtype=jnp.float32)
    params = init_params(kp)
    padded = pad_params(params)

    out = logistic_regression_forward(x, padded)
    out = jax.block_until_ready(out)

    ref = reference_forward(x, params)
    assert out["logits"].shape == (B, NUM_CLASSES), out["logits"].shape
    assert out["feat"].shape == (B, HIDDEN), out["feat"].shape
    assert jnp.allclose(out["logits"], ref["logits"], atol=2e-5, rtol=2e-5), "logits mismatch"
    assert jnp.allclose(out["feat"], ref["feat"], atol=2e-5, rtol=2e-5), "feat mismatch"

    print("KERNEL_OK")
</pallas_src>

<mosaic_0001>
module attributes {stable_mosaic.version = 11 : i64} {
  func.func @_mlp_kernel(%arg0: i32, %arg1: memref<16x128xf32, #tpu.memory_space<vmem>>, %arg2: memref<128x128xf32, #tpu.memory_space<vmem>>, %arg3: memref<1x128xf32, #tpu.memory_space<vmem>>, %arg4: memref<128x128xf32, #tpu.memory_space<vmem>>, %arg5: memref<1x128xf32, #tpu.memory_space<vmem>>, %arg6: memref<128x128xf32, #tpu.memory_space<vmem>>, %arg7: memref<1x128xf32, #tpu.memory_space<vmem>>, %arg8: memref<16x128xf32, #tpu.memory_space<vmem>>, %arg9: memref<16x128xf32, #tpu.memory_space<vmem>>) attributes {dimension_semantics = [#tpu.dimension_semantics<parallel>], iteration_bounds = array<i64: 1>, scalar_prefetch = 0 : i64, scratch_operands = 0 : i64, tpu.core_type = #tpu.core_type<tc>, window_params = [{transform_indices = @transform_0, window_bounds = array<i64: 16, 128>}, {pipeline_mode = #tpu.pipeline_mode<synchronous>, transform_indices = @transform_1, window_bounds = array<i64: 128, 128>}, {pipeline_mode = #tpu.pipeline_mode<synchronous>, transform_indices = @transform_2, window_bounds = array<i64: 1, 128>}, {pipeline_mode = #tpu.pipeline_mode<synchronous>, transform_indices = @transform_3, window_bounds = array<i64: 128, 128>}, {pipeline_mode = #tpu.pipeline_mode<synchronous>, transform_indices = @transform_4, window_bounds = array<i64: 1, 128>}, {pipeline_mode = #tpu.pipeline_mode<synchronous>, transform_indices = @transform_5, window_bounds = array<i64: 128, 128>}, {pipeline_mode = #tpu.pipeline_mode<synchronous>, transform_indices = @transform_6, window_bounds = array<i64: 1, 128>}, {transform_indices = @transform_7, window_bounds = array<i64: 16, 128>}, {transform_indices = @transform_8, window_bounds = array<i64: 16, 128>}]} {
    %c0 = arith.constant 0 : index
    %c0_0 = arith.constant 0 : index
    %0 = vector.load %arg1[%c0, %c0_0] : memref<16x128xf32, #tpu.memory_space<vmem>>, vector<16x128xf32>
    %c0_1 = arith.constant 0 : index
    %c0_2 = arith.constant 0 : index
    %1 = vector.load %arg2[%c0_1, %c0_2] : memref<128x128xf32, #tpu.memory_space<vmem>>, vector<128x128xf32>
    %cst = arith.constant dense<0.000000e+00> : vector<16x128xf32>
    %2 = tpu.matmul %0, %1, %cst {dimension_numbers = #tpu.dot_dimension_numbers<[1], [0], [0], [1], [0, 0, 1, 1], [], []>} : vector<16x128xf32>, vector<128x128xf32>, vector<16x128xf32> -> vector<16x128xf32>
    %c0_3 = arith.constant 0 : index
    %c0_4 = arith.constant 0 : index
    %3 = vector.load %arg3[%c0_3, %c0_4] : memref<1x128xf32, #tpu.memory_space<vmem>>, vector<1x128xf32>
    %4 = vector.broadcast %3 : vector<1x128xf32> to vector<16x128xf32>
    %5 = arith.addf %2, %4 : vector<16x128xf32>
    %cst_5 = arith.constant 0.000000e+00 : f32
    %6 = vector.broadcast %cst_5 : f32 to vector<16x128xf32>
    %7 = arith.maximumf %5, %6 : vector<16x128xf32>
    %c0_6 = arith.constant 0 : index
    %c0_7 = arith.constant 0 : index
    %8 = vector.load %arg4[%c0_6, %c0_7] : memref<128x128xf32, #tpu.memory_space<vmem>>, vector<128x128xf32>
    %cst_8 = arith.constant dense<0.000000e+00> : vector<16x128xf32>
    %9 = tpu.matmul %7, %8, %cst_8 {dimension_numbers = #tpu.dot_dimension_numbers<[1], [0], [0], [1], [0, 0, 1, 1], [], []>} : vector<16x128xf32>, vector<128x128xf32>, vector<16x128xf32> -> vector<16x128xf32>
    %c0_9 = arith.constant 0 : index
    %c0_10 = arith.constant 0 : index
    %10 = vector.load %arg5[%c0_9, %c0_10] : memref<1x128xf32, #tpu.memory_space<vmem>>, vector<1x128xf32>
    %11 = vector.broadcast %10 : vector<1x128xf32> to vector<16x128xf32>
    %12 = arith.addf %9, %11 : vector<16x128xf32>
    %cst_11 = arith.constant 0.000000e+00 : f32
    %13 = vector.broadcast %cst_11 : f32 to vector<16x128xf32>
    %14 = arith.maximumf %12, %13 : vector<16x128xf32>
    %c0_12 = arith.constant 0 : index
    %c0_13 = arith.constant 0 : index
    %15 = vector.load %arg9[%c0_12, %c0_13] : memref<16x128xf32, #tpu.memory_space<vmem>>, vector<16x128xf32>
    tpu.vector_store %arg9[%c0_12, %c0_13], %14 {strides = array<i32>} : memref<16x128xf32, #tpu.memory_space<vmem>>, vector<16x128xf32>,
    %c0_14 = arith.constant 0 : index
    %c0_15 = arith.constant 0 : index
    %16 = vector.load %arg6[%c0_14, %c0_15] : memref<128x128xf32, #tpu.memory_space<vmem>>, vector<128x128xf32>
    %cst_16 = arith.constant dense<0.000000e+00> : vector<16x128xf32>
    %17 = tpu.matmul %14, %16, %cst_16 {dimension_numbers = #tpu.dot_dimension_numbers<[1], [0], [0], [1], [0, 0, 1, 1], [], []>} : vector<16x128xf32>, vector<128x128xf32>, vector<16x128xf32> -> vector<16x128xf32>
    %c0_17 = arith.constant 0 : index
    %c0_18 = arith.constant 0 : index
    %18 = vector.load %arg7[%c0_17, %c0_18] : memref<1x128xf32, #tpu.memory_space<vmem>>, vector<1x128xf32>
    %19 = vector.broadcast %18 : vector<1x128xf32> to vector<16x128xf32>
    %20 = arith.addf %17, %19 : vector<16x128xf32>
    %c0_19 = arith.constant 0 : index
    %c0_20 = arith.constant 0 : index
    %21 = vector.load %arg8[%c0_19, %c0_20] : memref<16x128xf32, #tpu.memory_space<vmem>>, vector<16x128xf32>
    tpu.vector_store %arg8[%c0_19, %c0_20], %20 {strides = array<i32>} : memref<16x128xf32, #tpu.memory_space<vmem>>, vector<16x128xf32>,
    return
  }
  func.func @transform_0(%arg0: i32) -> (i32, i32) {
    %c0_i32 = arith.constant 0 : i32
    %c0_i32_0 = arith.constant 0 : i32
    return %arg0, %c0_i32 : i32, i32
  }
  func.func @transform_1(%arg0: i32) -> (i32, i32) {
    %c0_i32 = arith.constant 0 : i32
    %c0_i32_0 = arith.constant 0 : i32
    %c0_i32_1 = arith.constant 0 : i32
    return %c0_i32, %c0_i32_0 : i32, i32
  }
  func.func @transform_2(%arg0: i32) -> (i32, i32) {
    %c0_i32 = arith.constant 0 : i32
    %c0_i32_0 = arith.constant 0 : i32
    %c0_i32_1 = arith.constant 0 : i32
    return %c0_i32, %c0_i32_0 : i32, i32
  }
  func.func @transform_3(%arg0: i32) -> (i32, i32) {
    %c0_i32 = arith.constant 0 : i32
    %c0_i32_0 = arith.constant 0 : i32
    %c0_i32_1 = arith.constant 0 : i32
    return %c0_i32, %c0_i32_0 : i32, i32
  }
  func.func @transform_4(%arg0: i32) -> (i32, i32) {
    %c0_i32 = arith.constant 0 : i32
    %c0_i32_0 = arith.constant 0 : i32
    %c0_i32_1 = arith.constant 0 : i32
    return %c0_i32, %c0_i32_0 : i32, i32
  }
  func.func @transform_5(%arg0: i32) -> (i32, i32) {
    %c0_i32 = arith.constant 0 : i32
    %c0_i32_0 = arith.constant 0 : i32
    %c0_i32_1 = arith.constant 0 : i32
    return %c0_i32, %c0_i32_0 : i32, i32
  }
  func.func @transform_6(%arg0: i32) -> (i32, i32) {
    %c0_i32 = arith.constant 0 : i32
    %c0_i32_0 = arith.constant 0 : i32
    %c0_i32_1 = arith.constant 0 : i32
    return %c0_i32, %c0_i32_0 : i32, i32
  }
  func.func @transform_7(%arg0: i32) -> (i32, i32) {
    %c0_i32 = arith.constant 0 : i32
    %c0_i32_0 = arith.constant 0 : i32
    return %arg0, %c0_i32 : i32, i32
  }
  func.func @transform_8(%arg0: i32) -> (i32, i32) {
    %c0_i32 = arith.constant 0 : i32
    %c0_i32_0 = arith.constant 0 : i32
    return %arg0, %c0_i32 : i32, i32
  }
}

</mosaic_0001>

<bundles_post_ra>
// kernel: logistic_regression_forward.1
= control target key start
LH: loop header
LB: loop body
LE: loop exit
PB: predicated region body
PF: predicated region fallthrough
CT: control target
= control target key end

     0   :  { %14 = vsyncpa [#allocation3], 0  ;;  %s746_s0 = inlined_call_operand.vmem [shape: f32[16,128], index: 0, kind: input, shape index: {}]   ;;  %s747_s1 = inlined_call_operand.hbm [shape: f32[128,128], index: 1, kind: input, shape index: {}]   ;;  %s748_s2 = inlined_call_operand.vmem [shape: f32[1,128], index: 2, kind: input, shape index: {}]   ;;  %s749_s3 = inlined_call_operand.hbm [shape: f32[128,128], index: 3, kind: input, shape index: {}]   ;;  %s750_s4 = inlined_call_operand.vmem [shape: f32[1,128], index: 4, kind: input, shape index: {}]   ;;  %s751_s5 = inlined_call_operand.hbm [shape: f32[128,128], index: 5, kind: input, shape index: {}]   ;;  %s752_s6 = inlined_call_operand.vmem [shape: f32[1,128], index: 6, kind: input, shape index: {}]   ;;  %s753_s7 = inlined_call_operand.vmem [shape: f32[16,128], index: 7, kind: output, shape index: {0}]   ;;  %s754_s8 = inlined_call_operand.hbm [shape: f32[16,128], index: 8, kind: output, shape index: {1}]  }
   0x1   :  { %15 = vsyncpa [#allocation6], 0 }
   0x2   :  { %16 = vsyncpa [#allocation4], 0  ;;  %s650_s27 = smov [#allocation5]   ;;  %s651_s29 = smov [#allocation2]  }
   0x3   :  { %s38_s28 = sshll.u32 %s650_s27, 4  ;;  %s24_s30 = sshll.u32 %s651_s29, 4  ;;  %s39_s28 = int_to_ptr.vmem [resolvable:$true] %s38_s28  ;;  %s25_s30 = int_to_ptr.vmem [resolvable:$true] %s24_s30 }
   0x4   :  { %s572_s9 = scalar_lea.vmem %s39_s28, 2048  ;;  %p577_p1 = scmp.lt.s32.totalorder %s39_s28, %s39_s28 }
   0x5   :  { %p573_p0 = scmp.ne.s32.totalorder %s39_s28, %s572_s9  ;;  %p578_p2 = scmp.lt.s32.totalorder %s572_s9, %s572_s9 }
   0x7   :  { %p579_p3 = por %p578_p2, %p577_p1 }
   0x9   :  { %p580_p4 = pnand %p579_p3, %p573_p0 }
   0xb   :  { %583 = shalt.err (!%p580_p4)
}
   0xc   :  { %s652_s10 = smov 128   ;;  %s653_s11 = smov 8  }
   0xd   :  { %44 = dma.hbm_to_vmem [thread:$0]  %s749_s3, 2048, %s39_s28, [#allocation6], %s652_s10, %s652_s10, %s653_s11  }
   0xe   :  { %s592_s14 = scalar_lea.vmem %s25_s30, 2048  ;;  %p597_p6 = scmp.lt.s32.totalorder %s25_s30, %s25_s30 }
   0xf   :  { %p593_p5 = scmp.ne.s32.totalorder %s25_s30, %s592_s14  ;;  %p598_p7 = scmp.lt.s32.totalorder %s592_s14, %s592_s14 }
  0x11   :  { %p599_p8 = por %p598_p7, %p597_p6 }
  0x13   :  { %p600_p9 = pnand %p599_p8, %p593_p5 }
  0x15   :  { %603 = shalt.err (!%p600_p9)
}
  0x16   :  { %30 = dma.hbm_to_vmem [thread:$0]  %s747_s1, 2048, %s25_s30, [#allocation3], %s652_s10, %s652_s10, %s653_s11  }
  0x17   :  { %s654_s17 = smov [#allocation7]  }
  0x18   :  { %s52_s18 = sshll.u32 %s654_s17, 4  ;;  %s53_s18 = int_to_ptr.vmem [resolvable:$true] %s52_s18 }
  0x19   :  { %s612_s19 = scalar_lea.vmem %s53_s18, 2048  ;;  %p617_p11 = scmp.lt.s32.totalorder %s53_s18, %s53_s18 }
  0x1a   :  { %p613_p10 = scmp.ne.s32.totalorder %s53_s18, %s612_s19  ;;  %p618_p12 = scmp.lt.s32.totalorder %s612_s19, %s612_s19 }
  0x1c   :  { %p619_p13 = por %p618_p12, %p617_p11 }
  0x1e   :  { %p620_p0 = pnand %p619_p13, %p613_p10 }
  0x20   :  { %623 = shalt.err (!%p620_p0)
}
  0x21   :  { %58 = dma.hbm_to_vmem [thread:$0]  %s751_s5, 2048, %s53_s18, [#allocation6], %s652_s10, %s652_s10, %s653_s11  }
  0x22   :  { %644 = dma.done.wait [#allocation3], 2048  }
  0x23   :  { %645 = vsyncadd [#allocation3], 4294965248 }
  0x24   :  { %646 = dma.done.wait [#allocation6], 4096  }
  0x25   :  { %647 = vsyncadd [#allocation6], 4294963200  ;;  %v87_v0 = vld [vmem:[#allocation2 + $0x78] sm:$0xff]  ;;  %v86_v1 = vld [vmem:[#allocation2 + $0x70] sm:$0xff]  ;;  %s655_s25 = smov [#allocation8]  }
  0x26   :  { %453 = vmatprep.subr.mxu0 %v87_v0  ;;  %v85_v2 = vld [vmem:[#allocation2 + $0x68] sm:$0xff]  ;;  %v84_v3 = vld [vmem:[#allocation2 + $0x60] sm:$0xff]  ;;  %v83_v5 = vld [vmem:[#allocation2 + $0x58] sm:$0xff]  ;;  %s381_s26 = sshll.u32 %s655_s25, 4  ;;  %s382_s26 = int_to_ptr.vmem [resolvable:$true] %s381_s26 }
  0x27   :  { %454 = vmatpush3.msra.mxu0 %v87_v0  ;;  %v70_v4 = vld [vmem:[%s746_s0] sm:$0xff]  ;;  %v187_v6 = vld [vmem:[#allocation5 + $0x78] sm:$0xff]  ;;  %v186_v7 = vld [vmem:[#allocation5 + $0x70] sm:$0xff]  ;;  %s624_s27 = scalar_lea.vmem %s382_s26, 256  ;;  %p629_p2 = scmp.lt.s32.totalorder %s382_s26, %s382_s26 }
  0x28   :  { %455 = vmatprep.subr.mxu0 %v86_v1  ;;  %485 = vmatprep.mubr.f32.mxu0 %v70_v4  ;;  %v82_v8 = vld [vmem:[#allocation2 + $0x50] sm:$0xff]  ;;  %v185_v9 = vld [vmem:[#allocation5 + $0x68] sm:$0xff]  ;;  %v184_v11 = vld [vmem:[#allocation5 + $0x60] sm:$0xff]  ;;  %p625_p1 = scmp.ne.s32.totalorder %s382_s26, %s624_s27  ;;  %p630_p3 = scmp.lt.s32.totalorder %s624_s27, %s624_s27 }
  0x29   :  { %456 = vmatpush3.msra.mxu0 %v86_v1  ;;  %488 = vmatprep.subr.mxu1 %v187_v6  ;;  %v81_v10 = vld [vmem:[#allocation2 + $0x48] sm:$0xff]  ;;  %v80_v12 = vld [vmem:[#allocation2 + $0x40] sm:$0xff]  ;;  %v183_v13 = vld [vmem:[#allocation5 + $0x58] sm:$0xff] }
  0x2a   :  { %457 = vmatprep.subr.mxu0 %v85_v2  ;;  %489 = vmatpush3.msra.mxu1 %v187_v6  ;;  %v79_v14 = vld [vmem:[#allocation2 + $0x38] sm:$0xff]  ;;  %v182_v15 = vld [vmem:[#allocation5 + $0x50] sm:$0xff]  ;;  %v181_v17 = vld [vmem:[#allocation5 + $0x48] sm:$0xff]  ;;  %p631_p4 = por %p630_p3, %p629_p2 }
  0x2b   :  { %458 = vmatpush3.msra.mxu0 %v85_v2  ;;  %490 = vmatprep.subr.mxu1 %v186_v7  ;;  %v78_v16 = vld [vmem:[#allocation2 + $0x30] sm:$0xff]  ;;  %v77_v18 = vld [vmem:[#allocation2 + $0x28] sm:$0xff]  ;;  %v180_v19 = vld [vmem:[#allocation5 + $0x40] sm:$0xff] }
  0x2c   :  { %459 = vmatprep.subr.mxu0 %v84_v3  ;;  %491 = vmatpush3.msra.mxu1 %v186_v7  ;;  %v76_v20 = vld [vmem:[#allocation2 + $0x20] sm:$0xff]  ;;  %v179_v21 = vld [vmem:[#allocation5 + $0x38] sm:$0xff]  ;;  %v178_v23 = vld [vmem:[#allocation5 + $0x30] sm:$0xff]  ;;  %p632_p5 = pnand %p631_p4, %p625_p1 }
  0x2d   :  { %460 = vmatpush3.msra.mxu0 %v84_v3  ;;  %492 = vmatprep.subr.mxu1 %v185_v9  ;;  %v75_v22 = vld [vmem:[#allocation2 + $0x18] sm:$0xff]  ;;  %v74_v24 = vld [vmem:[#allocation2 + $0x10] sm:$0xff]  ;;  %v177_v25 = vld [vmem:[#allocation5 + $0x28] sm:$0xff] }
  0x2e   :  { %461 = vmatprep.subr.mxu0 %v83_v5  ;;  %493 = vmatpush3.msra.mxu1 %v185_v9  ;;  %v73_v26 = vld [vmem:[#allocation2 + $0x8] sm:$0xff]  ;;  %v176_v27 = vld [vmem:[#allocation5 + $0x20] sm:$0xff]  ;;  %v175_v30 = vld [vmem:[#allocation5 + $0x18] sm:$0xff] }
  0x2f   :  { %462 = vmatpush3.msra.mxu0 %v83_v5  ;;  %494 = vmatprep.subr.mxu1 %v184_v11  ;;  %v72_v28 = vld [vmem:[#allocation2] sm:$0xff]  ;;  %v71_v29 = vld [vmem:[%s746_s0 + $0x8] sm:$0xff]  ;;  %v174_v31 = vld [vmem:[#allocation5 + $0x10] sm:$0xff] }
  0x30   :  { %463 = vmatprep.subr.mxu0 %v82_v8  ;;  %495 = vmatpush3.msra.mxu1 %v184_v11  ;;  %v173_v32 = vld [vmem:[#allocation5 + $0x8] sm:$0xff]  ;;  %v172_v33 = vld [vmem:[#allocation5] sm:$0xff]  ;;  %v289_v34 = vld [vmem:[#allocation7 + $0x78] sm:$0xff] }
  0x31   :  { %464 = vmatpush3.msra.mxu0 %v82_v8  ;;  %496 = vmatprep.subr.mxu1 %v183_v13  ;;  %v288_v35 = vld [vmem:[#allocation7 + $0x70] sm:$0xff]  ;;  %v287_v36 = vld [vmem:[#allocation7 + $0x68] sm:$0xff]  ;;  %v286_v37 = vld [vmem:[#allocation7 + $0x60] sm:$0xff] }
  0x32   :  { %465 = vmatprep.subr.mxu0 %v81_v10  ;;  %497 = vmatpush3.msra.mxu1 %v183_v13  ;;  %v285_v38 = vld [vmem:[#allocation7 + $0x58] sm:$0xff]  ;;  %v284_v39 = vld [vmem:[#allocation7 + $0x50] sm:$0xff]  ;;  %v283_v40 = vld [vmem:[#allocation7 + $0x48] sm:$0xff] }
  0x33   :  { %466 = vmatpush3.msra.mxu0 %v81_v10  ;;  %498 = vmatprep.subr.mxu1 %v182_v15  ;;  %v282_v41 = vld [vmem:[#allocation7 + $0x40] sm:$0xff]  ;;  %v281_v42 = vld [vmem:[#allocation7 + $0x38] sm:$0xff]  ;;  %v280_v43 = vld [vmem:[#allocation7 + $0x30] sm:$0xff] }
  0x34   :  { %467 = vmatprep.subr.mxu0 %v80_v12  ;;  %499 = vmatpush3.msra.mxu1 %v182_v15  ;;  %v279_v44 = vld [vmem:[#allocation7 + $0x28] sm:$0xff]  ;;  %v278_v45 = vld [vmem:[#allocation7 + $0x20] sm:$0xff]  ;;  %v277_v53 = vld [vmem:[#allocation7 + $0x18] sm:$0xff] }
  0x35   :  { %468 = vmatpush3.msra.mxu0 %v80_v12  ;;  %500 = vmatprep.subr.mxu1 %v181_v17  ;;  %v396_v46 = vld [vmem:[%s748_s2] ss:$0 sm:$0xff]  ;;  %v276_v54 = vld [vmem:[#allocation7 + $0x10] sm:$0xff]  ;;  %v275_v55 = vld [vmem:[#allocation7 + $0x8] sm:$0xff] }
  0x36   :  { %469 = vmatprep.subr.mxu0 %v79_v14  ;;  %501 = vmatpush3.msra.mxu1 %v181_v17  ;;  %v274_v56 = vld [vmem:[#allocation7] sm:$0xff] }
  0x37   :  { %470 = vmatpush3.msra.mxu0 %v79_v14  ;;  %502 = vmatprep.subr.mxu1 %v180_v19  ;;  %v397_v57 = vld [vmem:[%s750_s4] ss:$0 sm:$0xff] }
  0x38   :  { %471 = vmatprep.subr.mxu0 %v78_v16  ;;  %503 = vmatpush3.msra.mxu1 %v180_v19 }
  0x39   :  { %472 = vmatpush3.msra.mxu0 %v78_v16  ;;  %504 = vmatprep.subr.mxu1 %v179_v21 }
  0x3a   :  { %473 = vmatprep.subr.mxu0 %v77_v18  ;;  %505 = vmatpush3.msra.mxu1 %v179_v21 }
  0x3b   :  { %474 = vmatpush3.msra.mxu0 %v77_v18  ;;  %506 = vmatprep.subr.mxu1 %v178_v23 }
  0x3c   :  { %475 = vmatprep.subr.mxu0 %v76_v20  ;;  %507 = vmatpush3.msra.mxu1 %v178_v23 }
  0x3d   :  { %476 = vmatpush3.msra.mxu0 %v76_v20  ;;  %508 = vmatprep.subr.mxu1 %v177_v25 }
  0x3e   :  { %477 = vmatprep.subr.mxu0 %v75_v22  ;;  %509 = vmatpush3.msra.mxu1 %v177_v25 }
  0x3f   :  { %478 = vmatpush3.msra.mxu0 %v75_v22  ;;  %510 = vmatprep.subr.mxu1 %v176_v27 }
  0x40   :  { %479 = vmatprep.subr.mxu0 %v74_v24  ;;  %511 = vmatpush3.msra.mxu1 %v176_v27 }
  0x41   :  { %480 = vmatpush3.msra.mxu0 %v74_v24  ;;  %512 = vmatprep.subr.mxu1 %v175_v30 }
  0x42   :  { %481 = vmatprep.subr.mxu0 %v73_v26  ;;  %513 = vmatpush3.msra.mxu1 %v175_v30 }
  0x43   :  { %482 = vmatpush3.msra.mxu0 %v73_v26  ;;  %514 = vmatprep.subr.mxu1 %v174_v31 }
  0x44   :  { %483 = vmatprep.subr.mxu0 %v72_v28  ;;  %515 = vmatpush3.msra.mxu1 %v174_v31 }
  0x45   :  { %484 = vmatpush3.msra.mxu0 %v72_v28  ;;  %516 = vmatprep.subr.mxu1 %v173_v32 }
  0x46   :  { %486 = vmatmul.mubr.f32.vlgmr.msra.gmra.mxu0 %v71_v29  ;;  %517 = vmatpush3.msra.mxu1 %v173_v32 }
  0x47   :  { %518 = vmatprep.subr.mxu1 %v172_v33  ;;  %523 = vmatprep.subr.mxu0 %v289_v34 }
  0x48   :  { %519 = vmatpush3.msra.mxu1 %v172_v33  ;;  %524 = vmatpush3.msra.mxu0 %v289_v34 }
  0x49   :  { %525 = vmatprep.subr.mxu0 %v288_v35 }
  0x4a   :  { %526 = vmatpush3.msra.mxu0 %v288_v35 }
  0x4b   :  { %527 = vmatprep.subr.mxu0 %v287_v36 }
  0x4c   :  { %528 = vmatpush3.msra.mxu0 %v287_v36 }
  0x4d   :  { %529 = vmatprep.subr.mxu0 %v286_v37 }
  0x4e   :  { %530 = vmatpush3.msra.mxu0 %v286_v37 }
  0x4f   :  { %531 = vmatprep.subr.mxu0 %v285_v38 }
  0x50   :  { %532 = vmatpush3.msra.mxu0 %v285_v38 }
  0x51   :  { %533 = vmatprep.subr.mxu0 %v284_v39 }
  0x52   :  { %534 = vmatpush3.msra.mxu0 %v284_v39 }
  0x53   :  { %535 = vmatprep.subr.mxu0 %v283_v40 }
  0x54   :  { %536 = vmatpush3.msra.mxu0 %v283_v40 }
  0x55   :  { %537 = vmatprep.subr.mxu0 %v282_v41 }
  0x56   :  { %538 = vmatpush3.msra.mxu0 %v282_v41 }
  0x57   :  { %539 = vmatprep.subr.mxu0 %v281_v42 }
  0x58   :  { %540 = vmatpush3.msra.mxu0 %v281_v42 }
  0x59   :  { %541 = vmatprep.subr.mxu0 %v280_v43 }
  0x5a   :  { %542 = vmatpush3.msra.mxu0 %v280_v43 }
  0x5b   :  { %543 = vmatprep.subr.mxu0 %v279_v44 }
  0x5c   :  { %544 = vmatpush3.msra.mxu0 %v279_v44 }
  0x5d   :  { %545 = vmatprep.subr.mxu0 %v278_v45 }
  0x5e   :  { %546 = vmatpush3.msra.mxu0 %v278_v45 }
  0x5f   :  { %547 = vmatprep.subr.mxu0 %v277_v53 }
  0x60   :  { %548 = vmatpush3.msra.mxu0 %v277_v53 }
  0x61   :  { %549 = vmatprep.subr.mxu0 %v276_v54 }
  0x62   :  { %550 = vmatpush3.msra.mxu0 %v276_v54 }
  0x63   :  { %551 = vmatprep.subr.mxu0 %v275_v55 }
  0x64   :  { %552 = vmatpush3.msra.mxu0 %v275_v55 }
  0x65   :  { %553 = vmatprep.subr.mxu0 %v274_v56 }
  0x66   :  { %554 = vmatpush3.msra.mxu0 %v274_v56 }
 0x106   :  { %v487_v47 = vpop.f32.mrf.mxu0 }
 0x107   :  { %v167_v48 = vadd.f32 %v487_v47, %v396_v46 }
 0x108   :  { %v161_v49 = vpop.f32.mrf.mxu0 }
 0x109   :  { %v162_v50 = vadd.f32 %v396_v46, %v161_v49  ;;  %v171_v52 = vmax.f32 %v167_v48, 0.0 }
 0x10b   :  { %v170_v51 = vmax.f32 %v162_v50, 0.0 }
 0x10d   :  { %520 = vmatprep.mubr.f32.mxu1 %v170_v51 }
 0x10e   :  { %521 = vmatmul.mubr.f32.vlgmr.msra.gmra.mxu1 %v171_v52 }
 0x1ce   :  { %v522_v58 = vpop.f32.mrf.mxu1 }
 0x1cf   :  { %v267_v59 = vadd.f32 %v522_v58, %v397_v57 }
 0x1d0   :  { %v261_v60 = vpop.f32.mrf.mxu1 }
 0x1d1   :  { %v271_v61 = vmax.f32 %v267_v59, 0.0  ;;  %v262_v62 = vadd.f32 %v397_v57, %v261_v60 }
 0x1d3   :  { %273 = vst [vmem:[#allocation8 + $0x8] sm:$0xff] %v271_v61  ;;  %v270_v63 = vmax.f32 %v262_v62, 0.0 }
 0x1d5   :  { %272 = vst [vmem:[#allocation8] sm:$0xff] %v270_v63  ;;  %555 = vmatprep.mubr.f32.mxu0 %v270_v63 }
 0x1d6   :  { %556 = vmatmul.mubr.f32.vlgmr.msra.gmra.mxu0 %v271_v61 }
 0x1d7   :  { %635 = shalt.err (!%p632_p5)
}
 0x1d8   :  { %387 = dma.vmem_to_hbm [thread:$0]  %s382_s26, 256, %s754_s8, [#allocation4], %s652_s10, %s652_s10, %s653_s11  }
 0x1d9   :  { %v398_v0 = vld [vmem:[%s752_s6] ss:$0 sm:$0xff] }
 0x296   :  { %v557_v1 = vpop.f32.mrf.mxu0 }
 0x297   :  { %v369_v2 = vadd.f32 %v557_v1, %v398_v0 }
 0x298   :  { %v363_v3 = vpop.f32.mrf.mxu0 }
 0x299   :  { %373 = vst [vmem:[%s753_s7 + $0x8] sm:$0xff] %v369_v2  ;;  %v364_v4 = vadd.f32 %v398_v0, %v363_v3 }
 0x29b   :  { %372 = vst [vmem:[%s753_s7] sm:$0xff] %v364_v4 }
 0x29c   :  { %648 = dma.done.wait [#allocation4], 256  }
 0x29d   :  { %649 = vsyncadd [#allocation4], 4294967040 }
 0x29e   :  { %393 = vsyncpa [#allocation3], 1 }
 0x29f   :  { %394 = vsyncpa [#allocation6], 1 }
 0x2a0   :  { %395 = vsyncpa [#allocation4], 1 }

</bundles_post_ra>
